<compile_context>
chip_gen: v7x
topology: tpu7x:2x2x1
jax: 0.10.0
libtpu: 0.0.40
codegen_flags: <defaults>
</compile_context>

<pallas_src>
import functools

import jax
import jax.numpy as jnp
from jax import lax
from jax.experimental import pallas as pl
from jax.experimental.pallas import tpu as pltpu


_LANES = 512                          # lane-dense last dim (multiple of 128)
_TARGET_BLOCK_BYTES = 4 * 1024 * 1024  # ~4 MiB per input block
_MAX_CORES = 2                        # leading "parallel" axis (v7x: 2 TCs)


def _dice_sums_kernel(yt_ref, yp_ref, out_ref, *, steps, nblocks,
                      g_full, tail_g, has_oob):
    # out_ref: (3, 8, L) f32 accumulator block, resident across the inner
    # ("arbitrary") grid axis; one such block per outer ("parallel") core.
    blk = pl.program_id(0) * steps + pl.program_id(1)

    @pl.when(pl.program_id(1) == 0)
    def _():
        out_ref[...] = jnp.zeros_like(out_ref)

    L = out_ref.shape[-1]

    def accumulate(num_slabs):
        # Fused single pass: each (8, L) slab of yt / yp is loaded exactly
        # once and feeds all three (8, L) VPU-only accumulators (no XLU
        # reduce, no materialized full-block product temp).
        def body(s, carry):
            acc_t, acc_p, acc_i = carry
            r = pl.multiple_of(s * 8, 8)
            yt = yt_ref[pl.ds(r, 8), :].astype(jnp.float32)
            yp = yp_ref[pl.ds(r, 8), :].astype(jnp.float32)
            return (acc_t + yt, acc_p + yp, acc_i + yt * yp)

        zero = jnp.zeros((8, L), jnp.float32)
        acc_t, acc_p, acc_i = lax.fori_loop(
            0, num_slabs, body, (zero, zero, zero),
            unroll=min(8, num_slabs))
        out_ref[0] += acc_t
        out_ref[1] += acc_p
        out_ref[2] += acc_i

    if tail_g > 0:
        # Ragged last block: full blocks take the fast path; only the single
        # tail block runs the shorter static-trip loop (valid rows are a
        # multiple of 8 by construction, so no element mask is needed).
        # Blocks with blk >= nblocks (odd block count split over 2 cores)
        # fall into neither branch and are skipped entirely.
        @pl.when(blk < nblocks - 1)
        def _():
            accumulate(g_full)

        @pl.when(blk == nblocks - 1)
        def _():
            accumulate(tail_g)
    elif has_oob:
        @pl.when(blk < nblocks)
        def _():
            accumulate(g_full)
    else:
        accumulate(g_full)


def _dice_sums(y_true, y_pred, *, max_block_rows=None):
    """Returns (sum(y_true), sum(y_pred), sum(y_true*y_pred)) as f32 scalars."""
    assert y_true.shape == y_pred.shape
    n = y_true.size
    L = _LANES

    yt_flat = y_true.reshape(-1)   # contiguous reshape: free (bitcast) in XLA
    yp_flat = y_pred.reshape(-1)

    align = 8 * L
    n_aligned = (n // align) * align

    # Tiny (<4096-element) ragged remainder handled with plain jnp, so no
    # full-array pad is ever materialized before the kernel runs.
    s_t = jnp.float32(0.0)
    s_p = jnp.float32(0.0)
    s_i = jnp.float32(0.0)
    if n_aligned != n:
        yt_r = yt_flat[n_aligned:].astype(jnp.float32)
        yp_r = yp_flat[n_aligned:].astype(jnp.float32)
        s_t = jnp.sum(yt_r)
        s_p = jnp.sum(yp_r)
        s_i = jnp.sum(yt_r * yp_r)

    rows = n_aligned // L
    if rows == 0:
        # Input smaller than one aligned slab: pure-jnp fallback.
        return s_t, s_p, s_i

    yt = yt_flat[:n_aligned].reshape(rows, L)
    yp = yp_flat[:n_aligned].reshape(rows, L)

    # Dtype-aware block size: ~4 MiB per input block (2048 rows f32,
    # 4096 rows bf16). 2 inputs x 2 buffers x 4 MiB = 16 MiB in flight.
    if max_block_rows is None:
        itemsize = max(jnp.dtype(y_true.dtype).itemsize,
                       jnp.dtype(y_pred.dtype).itemsize)
        max_block_rows = _TARGET_BLOCK_BYTES // (L * itemsize)
    max_block_rows = max(8, (max_block_rows // 8) * 8)
    block_rows = min(max_block_rows, rows)       # rows, block_rows: mult of 8

    nblocks = pl.cdiv(rows, block_rows)
    num_cores = _MAX_CORES if nblocks >= _MAX_CORES else 1
    steps = pl.cdiv(nblocks, num_cores)
    has_oob = (num_cores * steps) != nblocks     # some grid points past end
    rem_rows = rows % block_rows
    tail_g = rem_rows // 8                       # 0 => no ragged tail block
    g_full = block_rows // 8

    def in_map(c, i):
        blk = c * steps + i
        if has_oob:
            # Clamp fully out-of-range grid points onto the last valid block
            # (same index as the previous step -> its re-DMA is elided); the
            # kernel skips their compute via pl.when.
            blk = jnp.minimum(blk, nblocks - 1)
        return (blk, 0)

    kernel = functools.partial(
        _dice_sums_kernel, steps=steps, nblocks=nblocks,
        g_full=g_full, tail_g=tail_g, has_oob=has_oob)

    out_bytes = num_cores * 3 * 8 * L * 4
    bytes_accessed = (n * (jnp.dtype(y_true.dtype).itemsize
                           + jnp.dtype(y_pred.dtype).itemsize) + out_bytes)
    cost = pl.CostEstimate(flops=3 * n, transcendentals=0,
                           bytes_accessed=bytes_accessed)

    out = pl.pallas_call(
        kernel,
        out_shape=jax.ShapeDtypeStruct((num_cores * 3, 8, L), jnp.float32),
        grid_spec=pltpu.PrefetchScalarGridSpec(
            num_scalar_prefetch=0,
            grid=(num_cores, steps),
            in_specs=[
                pl.BlockSpec((block_rows, L), in_map),
                pl.BlockSpec((block_rows, L), in_map),
            ],
            out_specs=pl.BlockSpec((3, 8, L), lambda c, i: (c, 0, 0)),
        ),
        compiler_params=pltpu.CompilerParams(
            dimension_semantics=("parallel", "arbitrary"),
            vmem_limit_bytes=32 * 1024 * 1024,
        ),
        cost_estimate=cost,
    )(yt, yp)

    # Single tiny cross-lane reduce, done once outside the kernel.
    sums = out.reshape(num_cores, 3, 8 * L).sum(axis=(0, 2))
    return s_t + sums[0], s_p + sums[1], s_i + sums[2]


def dice_bce_loss_forward(y_pred, y_true, batch=True, *, max_block_rows=None):
    """Pallas equivalent of dice_bce_loss(batch=True).forward(y_pred, y_true).

    The torch forward computes `a = BCELoss(y_pred, y_true)` but discards it
    and returns only the soft dice loss `b`, so only the dice term is computed.
    Note: with smooth=0.0, all-zero inputs give 0/0 = NaN, matching the
    reference formula.
    """
    if not batch:
        # TODO(synk): batch=False (per-sample dice then mean) not implemented.
        raise NotImplementedError("only batch=True is supported")
    s_true, s_pred, inter = _dice_sums(y_true, y_pred,
                                       max_block_rows=max_block_rows)
    smooth = 0.0
    score = (2.0 * inter + smooth) / (s_true + s_pred + smooth)
    return 1.0 - score  # .mean() of a scalar is the identity


def _reference(y_pred, y_true):
    i = jnp.sum(y_true)
    j = jnp.sum(y_pred)
    inter = jnp.sum(y_true * y_pred)
    return 1.0 - 2.0 * inter / (i + j)


if __name__ == "__main__":
    key = jax.random.PRNGKey(0)
    k1, k2 = jax.random.split(key)

    # Primary example: small segmentation-like batch (single-block kernel
    # path + jnp remainder path).
    B, C, W, H = 2, 4, 48, 48
    y_pred = jax.random.uniform(k1, (B, C, W, H), dtype=jnp.float32,
                                minval=1e-3, maxval=1.0 - 1e-3)
    y_true = (jax.random.uniform(k2, (B, C, W, H)) > 0.5).astype(jnp.float32)

    loss = jax.block_until_ready(dice_bce_loss_forward(y_pred, y_true))
    ref = _reference(y_pred, y_true)
    assert jnp.allclose(loss, ref, rtol=1e-5, atol=1e-6), (loss, ref)

    # Extra check: aligned input, multi-slab fori_loop (unroll=8), no remainder.
    k3, k4 = jax.random.split(k1)
    yp2 = jax.random.uniform(k3, (2, 4, 128, 128), dtype=jnp.float32,
                             minval=1e-3, maxval=1.0 - 1e-3)
    yt2 = (jax.random.uniform(k4, (2, 4, 128, 128)) > 0.5).astype(jnp.float32)
    loss2 = jax.block_until_ready(dice_bce_loss_forward(yp2, yt2))
    ref2 = _reference(yp2, yt2)
    assert jnp.allclose(loss2, ref2, rtol=1e-5, atol=1e-6), (loss2, ref2)

    # Extra check: small block-size override to exercise the multi-block,
    # two-core, ragged-tail, out-of-range-block and remainder paths.
    k5, k6 = jax.random.split(k2)
    n3 = 40 * _LANES + 100
    yp3 = jax.random.uniform(k5, (n3,), dtype=jnp.float32,
                             minval=1e-3, maxval=1.0 - 1e-3)
    yt3 = (jax.random.uniform(k6, (n3,)) > 0.5).astype(jnp.float32)
    loss3 = jax.block_until_ready(
        dice_bce_loss_forward(yp3, yt3, max_block_rows=16))
    ref3 = _reference(yp3, yt3)
    assert jnp.allclose(loss3, ref3, rtol=1e-5, atol=1e-6), (loss3, ref3)

    print("KERNEL_OK")
</pallas_src>

<mosaic_0001>
module attributes {stable_mosaic.version = 11 : i64} {
  func.func @_dice_sums_kernel(%arg0: i32, %arg1: i32, %arg2: memref<32x512xf32, #tpu.memory_space<vmem>>, %arg3: memref<32x512xf32, #tpu.memory_space<vmem>>, %arg4: memref<3x8x512xf32, #tpu.memory_space<vmem>>) attributes {dimension_semantics = [#tpu.dimension_semantics<parallel>, #tpu.dimension_semantics<arbitrary>], iteration_bounds = array<i64: 1, 1>, scalar_prefetch = 0 : i64, scratch_operands = 0 : i64, tpu.core_type = #tpu.core_type<tc>, window_params = [{transform_indices = @transform_0, window_bounds = array<i64: 32, 512>}, {transform_indices = @transform_1, window_bounds = array<i64: 32, 512>}, {transform_indices = @transform_2, window_bounds = array<i64: 3, 8, 512>}]} {
    %c0_i32 = arith.constant 0 : i32
    %0 = arith.cmpi eq, %arg1, %c0_i32 : i32
    %1 = arith.extui %0 : i1 to i32
    %c0_i32_0 = arith.constant 0 : i32
    %2 = arith.cmpi ne, %1, %c0_i32_0 : i32
    scf.if %2 {
      %cst_28 = arith.constant 0.000000e+00 : f32
      %62 = vector.broadcast %cst_28 : f32 to vector<3x8x512xf32>
      %c0_29 = arith.constant 0 : index
      %c0_30 = arith.constant 0 : index
      %c0_31 = arith.constant 0 : index
      %63 = vector.load %arg4[%c0_29, %c0_30, %c0_31] : memref<3x8x512xf32, #tpu.memory_space<vmem>>, vector<3x8x512xf32>
      tpu.vector_store %arg4[%c0_29, %c0_30, %c0_31], %62 {strides = array<i32>} : memref<3x8x512xf32, #tpu.memory_space<vmem>>, vector<3x8x512xf32>,
    } else {
    }
    %cst = arith.constant 0.000000e+00 : f32
    %3 = vector.broadcast %cst : f32 to vector<8x512xf32>
    %c0_i32_1 = arith.constant 0 : i32
    %c8_i32 = arith.constant 8 : i32
    %4 = arith.muli %c0_i32_1, %c8_i32 : i32
    %5 = tpu.assume_multiple %4, 8 : i32
    %6 = arith.index_cast %5 : i32 to index
    %c0 = arith.constant 0 : index
    %7 = vector.load %arg2[%6, %c0] : memref<32x512xf32, #tpu.memory_space<vmem>>, vector<8x512xf32>
    %8 = arith.index_cast %5 : i32 to index
    %c0_2 = arith.constant 0 : index
    %9 = vector.load %arg3[%8, %c0_2] : memref<32x512xf32, #tpu.memory_space<vmem>>, vector<8x512xf32>
    %10 = arith.addf %3, %7 : vector<8x512xf32>
    %11 = arith.addf %3, %9 : vector<8x512xf32>
    %12 = arith.mulf %7, %9 : vector<8x512xf32>
    %13 = arith.addf %3, %12 : vector<8x512xf32>
    %c1_i32 = arith.constant 1 : i32
    %c8_i32_3 = arith.constant 8 : i32
    %14 = arith.muli %c1_i32, %c8_i32_3 : i32
    %15 = tpu.assume_multiple %14, 8 : i32
    %16 = arith.index_cast %15 : i32 to index
    %c0_4 = arith.constant 0 : index
    %17 = vector.load %arg2[%16, %c0_4] : memref<32x512xf32, #tpu.memory_space<vmem>>, vector<8x512xf32>
    %18 = arith.index_cast %15 : i32 to index
    %c0_5 = arith.constant 0 : index
    %19 = vector.load %arg3[%18, %c0_5] : memref<32x512xf32, #tpu.memory_space<vmem>>, vector<8x512xf32>
    %20 = arith.addf %10, %17 : vector<8x512xf32>
    %21 = arith.addf %11, %19 : vector<8x512xf32>
    %22 = arith.mulf %17, %19 : vector<8x512xf32>
    %23 = arith.addf %13, %22 : vector<8x512xf32>
    %c2_i32 = arith.constant 2 : i32
    %c8_i32_6 = arith.constant 8 : i32
    %24 = arith.muli %c2_i32, %c8_i32_6 : i32
    %25 = tpu.assume_multiple %24, 8 : i32
    %26 = arith.index_cast %25 : i32 to index
    %c0_7 = arith.constant 0 : index
    %27 = vector.load %arg2[%26, %c0_7] : memref<32x512xf32, #tpu.memory_space<vmem>>, vector<8x512xf32>
    %28 = arith.index_cast %25 : i32 to index
    %c0_8 = arith.constant 0 : index
    %29 = vector.load %arg3[%28, %c0_8] : memref<32x512xf32, #tpu.memory_space<vmem>>, vector<8x512xf32>
    %30 = arith.addf %20, %27 : vector<8x512xf32>
    %31 = arith.addf %21, %29 : vector<8x512xf32>
    %32 = arith.mulf %27, %29 : vector<8x512xf32>
    %33 = arith.addf %23, %32 : vector<8x512xf32>
    %c3_i32 = arith.constant 3 : i32
    %c8_i32_9 = arith.constant 8 : i32
    %34 = arith.muli %c3_i32, %c8_i32_9 : i32
    %35 = tpu.assume_multiple %34, 8 : i32
    %36 = arith.index_cast %35 : i32 to index
    %c0_10 = arith.constant 0 : index
    %37 = vector.load %arg2[%36, %c0_10] : memref<32x512xf32, #tpu.memory_space<vmem>>, vector<8x512xf32>
    %38 = arith.index_cast %35 : i32 to index
    %c0_11 = arith.constant 0 : index
    %39 = vector.load %arg3[%38, %c0_11] : memref<32x512xf32, #tpu.memory_space<vmem>>, vector<8x512xf32>
    %40 = arith.addf %30, %37 : vector<8x512xf32>
    %41 = arith.addf %31, %39 : vector<8x512xf32>
    %42 = arith.mulf %37, %39 : vector<8x512xf32>
    %43 = arith.addf %33, %42 : vector<8x512xf32>
    %c4_i32 = arith.constant 4 : i32
    %c0_12 = arith.constant 0 : index
    %c0_13 = arith.constant 0 : index
    %c0_14 = arith.constant 0 : index
    %44 = vector.load %arg4[%c0_12, %c0_13, %c0_14] : memref<3x8x512xf32, #tpu.memory_space<vmem>>, vector<1x8x512xf32>
    %45 = vector.shape_cast %44 : vector<1x8x512xf32> to vector<8x512xf32>
    %46 = arith.addf %45, %40 : vector<8x512xf32>
    %c0_15 = arith.constant 0 : index
    %c0_16 = arith.constant 0 : index
    %c0_17 = arith.constant 0 : index
    %47 = vector.load %arg4[%c0_15, %c0_16, %c0_17] : memref<3x8x512xf32, #tpu.memory_space<vmem>>, vector<1x8x512xf32>
    %48 = vector.shape_cast %47 : vector<1x8x512xf32> to vector<8x512xf32>
    %49 = vector.shape_cast %46 : vector<8x512xf32> to vector<1x8x512xf32>
    tpu.vector_store %arg4[%c0_15, %c0_16, %c0_17], %49 {strides = array<i32>} : memref<3x8x512xf32, #tpu.memory_space<vmem>>, vector<1x8x512xf32>,
    %c1 = arith.constant 1 : index
    %c0_18 = arith.constant 0 : index
    %c0_19 = arith.constant 0 : index
    %50 = vector.load %arg4[%c1, %c0_18, %c0_19] : memref<3x8x512xf32, #tpu.memory_space<vmem>>, vector<1x8x512xf32>
    %51 = vector.shape_cast %50 : vector<1x8x512xf32> to vector<8x512xf32>
    %52 = arith.addf %51, %41 : vector<8x512xf32>
    %c1_20 = arith.constant 1 : index
    %c0_21 = arith.constant 0 : index
    %c0_22 = arith.constant 0 : index
    %53 = vector.load %arg4[%c1_20, %c0_21, %c0_22] : memref<3x8x512xf32, #tpu.memory_space<vmem>>, vector<1x8x512xf32>
    %54 = vector.shape_cast %53 : vector<1x8x512xf32> to vector<8x512xf32>
    %55 = vector.shape_cast %52 : vector<8x512xf32> to vector<1x8x512xf32>
    tpu.vector_store %arg4[%c1_20, %c0_21, %c0_22], %55 {strides = array<i32>} : memref<3x8x512xf32, #tpu.memory_space<vmem>>, vector<1x8x512xf32>,
    %c2 = arith.constant 2 : index
    %c0_23 = arith.constant 0 : index
    %c0_24 = arith.constant 0 : index
    %56 = vector.load %arg4[%c2, %c0_23, %c0_24] : memref<3x8x512xf32, #tpu.memory_space<vmem>>, vector<1x8x512xf32>
    %57 = vector.shape_cast %56 : vector<1x8x512xf32> to vector<8x512xf32>
    %58 = arith.addf %57, %43 : vector<8x512xf32>
    %c2_25 = arith.constant 2 : index
    %c0_26 = arith.constant 0 : index
    %c0_27 = arith.constant 0 : index
    %59 = vector.load %arg4[%c2_25, %c0_26, %c0_27] : memref<3x8x512xf32, #tpu.memory_space<vmem>>, vector<1x8x512xf32>
    %60 = vector.shape_cast %59 : vector<1x8x512xf32> to vector<8x512xf32>
    %61 = vector.shape_cast %58 : vector<8x512xf32> to vector<1x8x512xf32>
    tpu.vector_store %arg4[%c2_25, %c0_26, %c0_27], %61 {strides = array<i32>} : memref<3x8x512xf32, #tpu.memory_space<vmem>>, vector<1x8x512xf32>,
    return
  }
  func.func @transform_0(%arg0: i32, %arg1: i32) -> (i32, i32) {
    %c1_i32 = arith.constant 1 : i32
    %0 = arith.muli %arg0, %c1_i32 : i32
    %1 = arith.addi %0, %arg1 : i32
    %c0_i32 = arith.constant 0 : i32
    %c0_i32_0 = arith.constant 0 : i32
    return %1, %c0_i32 : i32, i32
  }
  func.func @transform_1(%arg0: i32, %arg1: i32) -> (i32, i32) {
    %c1_i32 = arith.constant 1 : i32
    %0 = arith.muli %arg0, %c1_i32 : i32
    %1 = arith.addi %0, %arg1 : i32
    %c0_i32 = arith.constant 0 : i32
    %c0_i32_0 = arith.constant 0 : i32
    return %1, %c0_i32 : i32, i32
  }
  func.func @transform_2(%arg0: i32, %arg1: i32) -> (i32, i32, i32) {
    %c0_i32 = arith.constant 0 : i32
    %c0_i32_0 = arith.constant 0 : i32
    %c0_i32_1 = arith.constant 0 : i32
    return %arg0, %c0_i32, %c0_i32_0 : i32, i32, i32
  }
}

</mosaic_0001>

<bundles_post_ra>
// kernel: tpu_custom_call.1
= control target key start
LH: loop header
LB: loop body
LE: loop exit
PB: predicated region body
PF: predicated region fallthrough
CT: control target
= control target key end

     0   :  { %7 = vsyncpa [#allocation3], 0  ;;  %s407_s0 = inlined_call_operand.hbm [shape: f32[32,512], index: 0, kind: input, shape index: {}]   ;;  %s408_s1 = inlined_call_operand.hbm [shape: f32[32,512], index: 1, kind: input, shape index: {}]   ;;  %s409_s2 = inlined_call_operand.hbm [shape: f32[3,8,512], index: 2, kind: output, shape index: {}]  }
   0x1   :  { %8 = vsyncpa [#allocation6], 0 }
   0x2   :  { %9 = vsyncpa [#allocation4], 0  ;;  %s326_s9 = smov [#allocation2]   ;;  %s254_s13 = scalar_lea.hbm %s407_s0, 2048 }
   0x3   :  { %s20_s10 = sshll.u32 %s326_s9, 4  ;;  %p255_p0 = scmp.ne.s32.totalorder %s407_s0, %s254_s13  ;;  %s21_s10 = int_to_ptr.vmem [resolvable:$true] %s20_s10 }
   0x4   :  { %p258_p1 = scmp.lt.u32.totalorder %s254_s13, %s407_s0 }
   0x6   :  { %p260_p2 = pnand %p258_p1, %p255_p0 }
   0x8   :  { %263 = shalt.err (!%p260_p2)
}
   0x9   :  { %s264_s18 = scalar_lea.vmem %s21_s10, 2048  ;;  %p269_p4 = scmp.lt.s32.totalorder %s21_s10, %s21_s10 }
   0xa   :  { %p265_p3 = scmp.ne.s32.totalorder %s21_s10, %s264_s18  ;;  %p270_p5 = scmp.lt.s32.totalorder %s264_s18, %s264_s18 }
   0xc   :  { %p271_p6 = por %p270_p5, %p269_p4 }
   0xe   :  { %p272_p7 = pnand %p271_p6, %p265_p3 }
  0x10   :  { %275 = shalt.err (!%p272_p7)
}
  0x11   :  { %s327_s19 = smov 512   ;;  %s328_s20 = smov 32  }
  0x12   :  { %26 = dma.hbm_to_vmem [thread:$0]  %s407_s0, 2048, %s21_s10, [#allocation3], %s327_s19, %s327_s19, %s328_s20  }
  0x13   :  { %s329_s23 = smov [#allocation5]   ;;  %s276_s27 = scalar_lea.hbm %s408_s1, 2048 }
  0x14   :  { %s37_s24 = sshll.u32 %s329_s23, 4  ;;  %p277_p8 = scmp.ne.s32.totalorder %s408_s1, %s276_s27  ;;  %s38_s24 = int_to_ptr.vmem [resolvable:$true] %s37_s24 }
  0x15   :  { %p280_p9 = scmp.lt.u32.totalorder %s276_s27, %s408_s1 }
  0x17   :  { %p282_p10 = pnand %p280_p9, %p277_p8 }
  0x19   :  { %285 = shalt.err (!%p282_p10)
}
  0x1a   :  { %s286_s4 = scalar_lea.vmem %s38_s24, 2048  ;;  %p291_p12 = scmp.lt.s32.totalorder %s38_s24, %s38_s24 }
  0x1b   :  { %p287_p11 = scmp.ne.s32.totalorder %s38_s24, %s286_s4  ;;  %p292_p13 = scmp.lt.s32.totalorder %s286_s4, %s286_s4 }
  0x1d   :  { %p293_p0 = por %p292_p13, %p291_p12 }
  0x1f   :  { %p294_p1 = pnand %p293_p0, %p287_p11 }
  0x21   :  { %297 = shalt.err (!%p294_p1)
}
  0x22   :  { %43 = dma.hbm_to_vmem [thread:$0]  %s408_s1, 2048, %s38_s24, [#allocation6], %s327_s19, %s327_s19, %s328_s20  }
  0x23   :  { %320 = dma.done.wait [#allocation3], 2048  }
  0x24   :  { %321 = vsyncadd [#allocation3], 4294965248 }
  0x25   :  { %322 = dma.done.wait [#allocation6], 2048  }
  0x26   :  { %323 = vsyncadd [#allocation6], 4294965248  ;;  %v73_v0 = vld [vmem:[#allocation2] sm:$0xff]  ;;  %v74_v3 = vld [vmem:[#allocation2 + $0x8] sm:$0xff]  ;;  %s330_s1 = smov [#allocation7]  }
  0x27   :  { %v102_v1 = vld [vmem:[#allocation2 + $0x20] sm:$0xff]  ;;  %v103_v4 = vld [vmem:[#allocation2 + $0x28] sm:$0xff]  ;;  %v376_v10 = vld [vmem:[#allocation2 + $0x10] sm:$0xff]  ;;  %s229_s6 = sshll.u32 %s330_s1, 4  ;;  %s230_s6 = int_to_ptr.vmem [resolvable:$true] %s229_s6 }
  0x28   :  { %v112_v2 = vadd.f32 %v102_v1, %v73_v0  ;;  %v131_v5 = vld [vmem:[#allocation2 + $0x40] sm:$0xff]  ;;  %v113_v7 = vadd.f32 %v103_v4, %v74_v3  ;;  %v132_v9 = vld [vmem:[#allocation2 + $0x48] sm:$0xff]  ;;  %v378_v11 = vld [vmem:[#allocation2 + $0x30] sm:$0xff]  ;;  %s298_s7 = scalar_lea.vmem %s230_s6, 1536  ;;  %p303_p3 = scmp.lt.s32.totalorder %s230_s6, %s230_s6 }
  0x29   :  { %v160_v6 = vld [vmem:[#allocation2 + $0x60] sm:$0xff]  ;;  %v161_v13 = vld [vmem:[#allocation2 + $0x68] sm:$0xff]  ;;  %v114_v14 = vadd.f32 %v378_v11, %v376_v10  ;;  %v382_v15 = vld [vmem:[#allocation2 + $0x18] sm:$0xff]  ;;  %p299_p2 = scmp.ne.s32.totalorder %s230_s6, %s298_s7  ;;  %p304_p4 = scmp.lt.s32.totalorder %s298_s7, %s298_s7 }
  0x2a   :  { %v141_v8 = vadd.f32 %v131_v5, %v112_v2  ;;  %v142_v12 = vadd.f32 %v132_v9, %v113_v7  ;;  %v384_v16 = vld [vmem:[#allocation2 + $0x38] sm:$0xff]  ;;  %v133_v18 = vld [vmem:[#allocation2 + $0x50] sm:$0xff]  ;;  %v79_v20 = vld [vmem:[#allocation5] sm:$0xff] }
  0x2b   :  { %v115_v19 = vadd.f32 %v384_v16, %v382_v15  ;;  %v108_v21 = vld [vmem:[#allocation5 + $0x20] sm:$0xff]  ;;  %v143_v23 = vadd.f32 %v133_v18, %v114_v14  ;;  %v134_v24 = vld [vmem:[#allocation2 + $0x58] sm:$0xff]  ;;  %v91_v28 = vmul.f32 %v79_v20, %v73_v0  ;;  %v162_v29 = vld [vmem:[#allocation2 + $0x70] sm:$0xff]  ;;  %p305_p5 = por %p304_p4, %p303_p3 }
  0x2c   :  { %v170_v17 = vadd.f32 %v160_v6, %v141_v8  ;;  %v171_v22 = vadd.f32 %v161_v13, %v142_v12  ;;  %v116_v25 = vadd.f32 %v108_v21, %v79_v20  ;;  %v137_v26 = vld [vmem:[#allocation5 + $0x40] sm:$0xff]  ;;  %v80_v31 = vld [vmem:[#allocation5 + $0x8] sm:$0xff]  ;;  %v120_v33 = vmul.f32 %v108_v21, %v102_v1  ;;  %v163_v36 = vld [vmem:[#allocation2 + $0x78] sm:$0xff] }
  0x2d   :  { %v166_v27 = vld [vmem:[#allocation5 + $0x60] sm:$0xff]  ;;  %v144_v30 = vadd.f32 %v134_v24, %v115_v19  ;;  %v109_v32 = vld [vmem:[#allocation5 + $0x28] sm:$0xff]  ;;  %v149_v34 = vmul.f32 %v137_v26, %v131_v5  ;;  %v172_v35 = vadd.f32 %v162_v29, %v143_v23  ;;  %v81_v39 = vld [vmem:[#allocation5 + $0x10] sm:$0xff]  ;;  %v92_v56 = vmul.f32 %v80_v31, %v74_v3  ;;  %p306_p6 = pnand %p305_p5, %p299_p2 }
  0x2e   :  { %v145_v37 = vadd.f32 %v137_v26, %v116_v25  ;;  %v117_v38 = vadd.f32 %v109_v32, %v80_v31  ;;  %v110_v40 = vld [vmem:[#allocation5 + $0x30] sm:$0xff]  ;;  %194 = vst [vmem:[#allocation7] sm:$0xff] %v170_v17  ;;  %v138_v42 = vld [vmem:[#allocation5 + $0x48] sm:$0xff]  ;;  %v82_v44 = vld [vmem:[#allocation5 + $0x18] sm:$0xff]  ;;  %v124_v46 = vadd.f32 %v120_v33, %v91_v28  ;;  %v178_v47 = vmul.f32 %v166_v27, %v160_v6 }
  0x2f   :  { %v173_v41 = vadd.f32 %v163_v36, %v144_v30  ;;  %v118_v43 = vadd.f32 %v110_v40, %v81_v39  ;;  %v111_v45 = vld [vmem:[#allocation5 + $0x38] sm:$0xff]  ;;  %195 = vst [vmem:[#allocation7 + $0x8] sm:$0xff] %v171_v22  ;;  %v167_v50 = vld [vmem:[#allocation5 + $0x68] sm:$0xff]  ;;  %v139_v51 = vld [vmem:[#allocation5 + $0x50] sm:$0xff]  ;;  %v121_v60 = vmul.f32 %v109_v32, %v103_v4  ;;  %v150_v0 = vmul.f32 %v138_v42, %v132_v9 }
  0x30   :  { %v174_v48 = vadd.f32 %v166_v27, %v145_v37  ;;  %v146_v49 = vadd.f32 %v138_v42, %v117_v38  ;;  %v119_v52 = vadd.f32 %v111_v45, %v82_v44  ;;  %v140_v54 = vld [vmem:[#allocation5 + $0x58] sm:$0xff]  ;;  %v153_v55 = vadd.f32 %v149_v34, %v124_v46  ;;  %196 = vst [vmem:[#allocation7 + $0x10] sm:$0xff] %v172_v35  ;;  %v168_v58 = vld [vmem:[#allocation5 + $0x70] sm:$0xff] }
  0x31   :  { %v147_v53 = vadd.f32 %v139_v51, %v118_v43  ;;  %197 = vst [vmem:[#allocation7 + $0x18] sm:$0xff] %v173_v41  ;;  %v169_v62 = vld [vmem:[#allocation5 + $0x78] sm:$0xff]  ;;  %v179_v1 = vmul.f32 %v167_v50, %v161_v13  ;;  %v125_v5 = vadd.f32 %v121_v60, %v92_v56  ;;  %v93_v6 = vmul.f32 %v81_v39, %v376_v10 }
  0x32   :  { %v175_v57 = vadd.f32 %v167_v50, %v146_v49  ;;  %v148_v59 = vadd.f32 %v140_v54, %v119_v52  ;;  %v182_v63 = vadd.f32 %v178_v47, %v153_v55  ;;  %207 = vst [vmem:[#allocation7 + $0x20] sm:$0xff] %v174_v48  ;;  %v122_v7 = vmul.f32 %v110_v40, %v378_v11 }
  0x33   :  { %v176_v61 = vadd.f32 %v168_v58, %v147_v53  ;;  %v151_v8 = vmul.f32 %v139_v51, %v133_v18  ;;  %v154_v3 = vadd.f32 %v150_v0, %v125_v5  ;;  %v94_v12 = vmul.f32 %v82_v44, %v382_v15 }
  0x34   :  { %v177_v2 = vadd.f32 %v169_v62, %v148_v59  ;;  %208 = vst [vmem:[#allocation7 + $0x28] sm:$0xff] %v175_v57  ;;  %220 = vst [vmem:[#allocation7 + $0x40] sm:$0xff] %v182_v63  ;;  %v126_v4 = vadd.f32 %v122_v7, %v93_v6  ;;  %v180_v14 = vmul.f32 %v168_v58, %v162_v29 }
  0x35   :  { %209 = vst [vmem:[#allocation7 + $0x30] sm:$0xff] %v176_v61  ;;  %v123_v17 = vmul.f32 %v111_v45, %v384_v16  ;;  %v152_v9 = vmul.f32 %v140_v54, %v134_v24  ;;  %v183_v13 = vadd.f32 %v179_v1, %v154_v3  ;;  %v181_v21 = vmul.f32 %v169_v62, %v163_v36 }
  0x36   :  { %210 = vst [vmem:[#allocation7 + $0x38] sm:$0xff] %v177_v2  ;;  %v155_v19 = vadd.f32 %v151_v8, %v126_v4 }
  0x37   :  { %v127_v20 = vadd.f32 %v123_v17, %v94_v12  ;;  %221 = vst [vmem:[#allocation7 + $0x48] sm:$0xff] %v183_v13 }
  0x38   :  { %v184_v10 = vadd.f32 %v180_v14, %v155_v19 }
  0x39   :  { %v156_v22 = vadd.f32 %v152_v9, %v127_v20 }
  0x3a   :  { %222 = vst [vmem:[#allocation7 + $0x50] sm:$0xff] %v184_v10 }
  0x3b   :  { %v185_v11 = vadd.f32 %v181_v21, %v156_v22 }
  0x3d   :  { %223 = vst [vmem:[#allocation7 + $0x58] sm:$0xff] %v185_v11 }
  0x3e   :  { %309 = shalt.err (!%p306_p6)
}
  0x3f   :  { %s310_s10 = scalar_lea.hbm %s409_s2, 1536 }
  0x40   :  { %p311_p7 = scmp.ne.s32.totalorder %s409_s2, %s310_s10  ;;  %p314_p8 = scmp.lt.u32.totalorder %s310_s10, %s409_s2 }
  0x42   :  { %p316_p9 = pnand %p314_p8, %p311_p7 }
  0x44   :  { %319 = shalt.err (!%p316_p9)
}
  0x45   :  { %235 = dma.vmem_to_hbm [thread:$0]  %s230_s6, 1536, %s409_s2, [#allocation4], %s327_s19, %s327_s19, %s328_s20  }
  0x46   :  { %324 = dma.done.wait [#allocation4], 1536  }
  0x47   :  { %325 = vsyncadd [#allocation4], 4294965760 }
  0x48   :  { %239 = vsyncpa [#allocation3], 1 }
  0x49   :  { %240 = vsyncpa [#allocation6], 1 }
  0x4a   :  { %241 = vsyncpa [#allocation4], 1 }

</bundles_post_ra>
